<compile_context>
chip_gen: v7x
topology: tpu7x:2x2x1
jax: 0.10.0
libtpu: 0.0.40
codegen_flags: <defaults>
</compile_context>

<pallas_src>
import jax
import jax.numpy as jnp
from jax.experimental import pallas as pl
from jax.experimental.pallas import tpu as pltpu


def _zero_fill_kernel(x_hbm_ref, o_ref):
    # x_hbm_ref is a raw HBM ref (memory_space=pl.ANY) and is intentionally
    # never read — the output is identically zero.
    del x_hbm_ref
    o_ref[...] = jnp.zeros(o_ref.shape, o_ref.dtype)


def _pick_lane_cols(total):
    """Largest multiple of 128 (<= 4096) that exactly divides `total`."""
    for cols in (4096, 2048, 1024, 512, 256, 128):
        if total % cols == 0:
            return cols
    return None


def zero_forward(x, stride):
    """Pallas equivalent of Zero(stride).forward(x) for NCHW input."""
    N, C, H, W = x.shape
    if stride == 1:
        Ho, Wo = H, W
    else:
        # ceil(H/stride), ceil(W/stride) — matches x[..., ::stride, ::stride].
        Ho = -(-H // stride)
        Wo = -(-W // stride)

    total = N * C * Ho * Wo
    cols = _pick_lane_cols(total)

    if cols is not None:
        # Lane-dense flattened slab: (rows, cols) with cols a big multiple of
        # 128; block ~1M elements (~4 MiB f32) per grid step.
        rows = total // cols
        tile_rows = min(rows, max(8, (1 << 20) // cols))
        grid = (pl.cdiv(rows, tile_rows),)
        flat = pl.pallas_call(
            _zero_fill_kernel,
            out_shape=jax.ShapeDtypeStruct((rows, cols), x.dtype),
            grid=grid,
            in_specs=[pl.BlockSpec(memory_space=pl.ANY)],
            out_specs=pl.BlockSpec((tile_rows, cols), lambda i: (i, 0)),
            compiler_params=pltpu.CompilerParams(
                dimension_semantics=("parallel",)
            ),
        )(x)
        return flat.reshape(N, C, Ho, Wo)

    # Fallback (total not a multiple of 128): keep the spatial plane intact so
    # the block's last two dims equal the full array dims (valid layout), and
    # batch many (n, c) planes per grid step to amortize per-step overhead.
    nc = N * C
    tile_nc = min(nc, max(1, (1 << 20) // max(1, Ho * Wo)))
    grid = (pl.cdiv(nc, tile_nc),)
    out = pl.pallas_call(
        _zero_fill_kernel,
        out_shape=jax.ShapeDtypeStruct((nc, Ho, Wo), x.dtype),
        grid=grid,
        in_specs=[pl.BlockSpec(memory_space=pl.ANY)],
        out_specs=pl.BlockSpec((tile_nc, Ho, Wo), lambda i: (i, 0, 0)),
        compiler_params=pltpu.CompilerParams(
            dimension_semantics=("parallel",)
        ),
    )(x)
    return out.reshape(N, C, Ho, Wo)


if __name__ == "__main__":
    key = jax.random.PRNGKey(0)
    x = jax.random.normal(key, (2, 4, 16, 16), dtype=jnp.float32)

    # stride = 1 case: output same shape, all zeros.
    out1 = jax.block_until_ready(zero_forward(x, stride=1))
    ref1 = x * 0.0
    assert out1.shape == ref1.shape, (out1.shape, ref1.shape)
    assert out1.dtype == ref1.dtype
    assert jnp.array_equal(out1, ref1)

    # stride = 2 case: spatial subsample then zero.
    out2 = jax.block_until_ready(zero_forward(x, stride=2))
    ref2 = x[:, :, ::2, ::2] * 0.0
    assert out2.shape == ref2.shape, (out2.shape, ref2.shape)
    assert out2.dtype == ref2.dtype
    assert jnp.array_equal(out2, ref2)

    # stride = 3 case exercises the same lane-dense path with non-square tiles.
    out3 = jax.block_until_ready(zero_forward(x, stride=3))
    ref3 = x[:, :, ::3, ::3] * 0.0
    assert out3.shape == ref3.shape, (out3.shape, ref3.shape)
    assert jnp.array_equal(out3, ref3)

    print("KERNEL_OK")
</pallas_src>

<mosaic_0001>
module attributes {stable_mosaic.version = 11 : i64} {
  func.func @_zero_fill_kernel(%arg0: i32, %arg1: memref<2x4x16x16xf32, #tpu.memory_space<any>>, %arg2: memref<1x2048xf32, #tpu.memory_space<vmem>>) attributes {dimension_semantics = [#tpu.dimension_semantics<parallel>], iteration_bounds = array<i64: 1>, scalar_prefetch = 0 : i64, scratch_operands = 0 : i64, tpu.core_type = #tpu.core_type<tc>, window_params = [{}, {transform_indices = @transform_1, window_bounds = array<i64: 1, 2048>}]} {
    %cst = arith.constant 0.000000e+00 : f32
    %0 = vector.broadcast %cst : f32 to vector<1x2048xf32>
    %c0 = arith.constant 0 : index
    %c0_0 = arith.constant 0 : index
    %1 = vector.load %arg2[%c0, %c0_0] : memref<1x2048xf32, #tpu.memory_space<vmem>>, vector<1x2048xf32>
    tpu.vector_store %arg2[%c0, %c0_0], %0 {strides = array<i32>} : memref<1x2048xf32, #tpu.memory_space<vmem>>, vector<1x2048xf32>,
    return
  }
  func.func @transform_1(%arg0: i32) -> (i32, i32) {
    %c0_i32 = arith.constant 0 : i32
    %c0_i32_0 = arith.constant 0 : i32
    return %arg0, %c0_i32 : i32, i32
  }
}

</mosaic_0001>

<bundles_post_ra>
// kernel: tpu_custom_call.1
= control target key start
LH: loop header
LB: loop body
LE: loop exit
PB: predicated region body
PF: predicated region fallthrough
CT: control target
= control target key end

     0   :  { %6 = vsyncpa [#allocation3], 0  ;;  %v49_v0 = vmov 0.0   ;;  %s50_s6 = smov [#allocation2]   ;;  %s73_s0 = inlined_call_operand.hbm [shape: f32[2,4,16,16], index: 0, kind: input, shape index: {}]   ;;  %s74_s1 = inlined_call_operand.hbm [shape: f32[1,2048], index: 1, kind: output, shape index: {}]  }
   0x1   :  { %7 = vst [vmem:[#allocation2] sm:$0xff] %v49_v0  ;;  %8 = vst [vmem:[#allocation2 + $0x8] sm:$0xff] %v49_v0  ;;  %s15_s7 = sshll.u32 %s50_s6, 4  ;;  %s16_s7 = int_to_ptr.vmem [resolvable:$true] %s15_s7 }
   0x2   :  { %s25_s8 = scalar_lea.vmem %s16_s7, 256  ;;  %p30_p1 = scmp.lt.s32.totalorder %s16_s7, %s16_s7 }
   0x3   :  { %p26_p0 = scmp.ne.s32.totalorder %s16_s7, %s25_s8  ;;  %p31_p2 = scmp.lt.s32.totalorder %s25_s8, %s25_s8 }
   0x5   :  { %p32_p3 = por %p31_p2, %p30_p1 }
   0x7   :  { %p33_p4 = pnand %p32_p3, %p26_p0 }
   0x9   :  { %36 = shalt.err (!%p33_p4)
}
   0xa   :  { %s37_s0 = scalar_lea.hbm %s74_s1, 256 }
   0xb   :  { %p38_p5 = scmp.ne.s32.totalorder %s74_s1, %s37_s0  ;;  %p41_p6 = scmp.lt.u32.totalorder %s37_s0, %s74_s1 }
   0xd   :  { %p43_p7 = pnand %p41_p6, %p38_p5 }
   0xf   :  { %46 = shalt.err (!%p43_p7)
}
  0x10   :  { %18 = dma.vmem_to_hbm [thread:$0]  %s16_s7, 256, %s74_s1, [#allocation3]  }
  0x11   :  { %47 = dma.done.wait [#allocation3], 256  }
  0x12   :  { %48 = vsyncadd [#allocation3], 4294967040 }
  0x13   :  { %22 = vsyncpa [#allocation3], 1 }

</bundles_post_ra>
